<compile_context>
chip_gen: v7x
topology: tpu7x:2x2x1
jax: 0.10.0
libtpu: 0.0.40
codegen_flags: <defaults>
</compile_context>

<pallas_src>
import jax
import jax.numpy as jnp
from jax import lax
from jax.experimental import pallas as pl
from jax.experimental.pallas import tpu as pltpu

GN_EPS = 1e-5   # torch.nn.GroupNorm default
LANE = 128


def _round_up(a, m):
    return (a + m - 1) // m * m


def _vmem_budget_and_limit():
    """Per-generation VMEM budgeting: ~96 MiB limit on 128 MiB parts (v5e/v6e),
    ~48 MiB on 64 MiB/TC parts (v7x).  Tile budget is 60% of the limit."""
    phys = 64 * 1024 * 1024  # conservative default (v7x per-TC)
    try:
        phys = int(getattr(pltpu.get_tpu_info(), "vmem_capacity_bytes", phys))
    except Exception:
        pass
    limit = 96 * 1024 * 1024 if phys > 64 * 1024 * 1024 else 48 * 1024 * 1024
    return int(limit * 0.6), limit


def _pick_tile_n_mm(N, Cp, Coutp, itemsize, budget, fold):
    """Largest multiple-of-8 spatial tile (<=1024 rows) whose matmul-kernel working set
    fits `budget`.  x tile and output tile share the matmul dtype (review fix)."""
    tile = min(_round_up(N, 8), 1024)
    while tile > 8:
        need = (2 * tile * Cp * itemsize          # x tile: 2 pipeline buffers
                + 2 * tile * Coutp * itemsize)    # out tile (mm dtype): 2 pipeline buffers
        if fold:
            need += 2 * Cp * Coutp * itemsize     # per-batch scaled W2: 2 buffers
        else:
            need += 2 * Cp * Coutp * itemsize + 2 * Cp * itemsize   # shared W2 + scale
        if need <= budget:
            break
        tile = max(8, _round_up(tile // 2, 8))
    return tile


def _pick_tile_n_gap(N, Cp, itemsize, budget, tile_mm):
    """GAP-only spatial tile: a multiple of tile_mm (so both kernels share one padded
    buffer), as large as the budget allows (fewer grid steps, bigger DMAs)."""
    cap = min(_round_up(N, tile_mm), 8 * tile_mm, 4096)
    k = max(1, cap // tile_mm)
    while k > 1:
        if 2 * k * tile_mm * Cp * itemsize <= budget:
            break
        k -= 1
    return k * tile_mm


# --------------------------------------------------------------------------------------
# Pallas kernels
# --------------------------------------------------------------------------------------
def _gap_kernel(x_ref, o_ref):
    # x_ref: (1, TILE_GAP, Cp) mm_dtype ; o_ref: (1, 1, Cp) f32 accumulator, resident
    # across the reduction (last) grid axis.  Upcast before summing.
    @pl.when(pl.program_id(1) == 0)
    def _init():
        o_ref[...] = jnp.zeros_like(o_ref)

    o_ref[...] += jnp.sum(x_ref[...].astype(jnp.float32), axis=1, keepdims=True)


def _scale_conv_kernel(x_ref, s_ref, w_ref, o_ref):
    # x_ref: (1, TILE_N, Cp); s_ref: (1, 1, Cp) = (1 + atten) per batch;
    # w_ref: (Cp, Coutp) shared W2 (constant index_map -> DMA'd once);
    # o_ref: (1, TILE_N, Coutp) in mm dtype.  VPU scale + lane-dense MXU matmul, f32 acc.
    xs = x_ref[0] * s_ref[0]
    o_ref[0] = jnp.dot(xs, w_ref[...],
                       preferred_element_type=jnp.float32).astype(o_ref.dtype)


def _fold_conv_kernel(x_ref, w_ref, o_ref):
    # x_ref: (1, TILE_N, Cp); w_ref: (1, Cp, Coutp) — W2 rows pre-scaled by (1 + atten);
    # o_ref: (1, TILE_N, Coutp) in mm dtype.  Pure streaming matmul, f32 accumulation.
    o_ref[0] = jnp.dot(x_ref[0], w_ref[0],
                       preferred_element_type=jnp.float32).astype(o_ref.dtype)


# --------------------------------------------------------------------------------------
# Wrapper
# --------------------------------------------------------------------------------------
def sfe_forward(x_nchw, w1, gn_gamma, gn_beta, w2, num_groups=16, use_bf16=True,
                fold_weights=None):
    """x_nchw: (B, C, H, W); w1: (C, C, 1, 1); w2: (Cout, C, 1, 1). Returns (B, Cout, H, W)."""
    B, C, H, W = x_nchw.shape
    Cout = w2.shape[0]
    N = H * W
    assert C % num_groups == 0, "GroupNorm requires C % num_groups == 0"

    Cp = _round_up(C, LANE)
    Coutp = _round_up(Cout, LANE)

    mm_dtype = jnp.bfloat16 if use_bf16 else jnp.float32
    mm_itemsize = 2 if use_bf16 else 4

    if fold_weights is None:
        # Fold (materializes (B,Cp,Coutp) weights in HBM) only when that is tiny relative
        # to the x traffic per batch, i.e. large-N / small-C shapes.
        fold_weights = (Coutp * 8 <= N)

    budget, vmem_limit = _vmem_budget_and_limit()
    tile_mm = _pick_tile_n_mm(N, Cp, Coutp, mm_itemsize, budget, fold_weights)
    tile_gap = _pick_tile_n_gap(N, Cp, mm_itemsize, budget, tile_mm)
    Np = _round_up(N, tile_gap)                      # multiple of both tiles

    # ---- single padded channels-last copy of x, already in the matmul dtype ----
    # (transpose -> reshape -> pad -> cast fuse into one XLA pass; fed to BOTH kernels)
    x_mm = jnp.pad(
        jnp.transpose(x_nchw, (0, 2, 3, 1)).reshape(B, N, C),
        ((0, 0), (0, Np - N), (0, Cp - C)),
    ).astype(mm_dtype)                                                   # (B, Np, Cp)

    # ---- Pallas kernel 1: global average pool over spatial (tiled reduction, f32 acc) ----
    gap_sum = pl.pallas_call(
        _gap_kernel,
        out_shape=jax.ShapeDtypeStruct((B, 1, Cp), jnp.float32),
        grid=(B, Np // tile_gap),
        in_specs=[pl.BlockSpec((1, tile_gap, Cp), lambda b, n: (b, n, 0))],
        out_specs=pl.BlockSpec((1, 1, Cp), lambda b, n: (b, 0, 0)),
        compiler_params=pltpu.CompilerParams(
            dimension_semantics=("parallel", "arbitrary"),
            vmem_limit_bytes=vmem_limit),
    )(x_mm)
    gap = gap_sum[:, 0, :C] / float(N)                                   # (B, C) f32

    # ---- tiny attention path: conv_atten -> GroupNorm(16) -> sigmoid (O(B*C^2), in XLA) ----
    a = gap @ jnp.transpose(w1.reshape(C, C)).astype(jnp.float32)        # 1x1 conv, no bias
    g = C // num_groups
    ag = a.reshape(B, num_groups, g)
    mu = jnp.mean(ag, axis=2, keepdims=True)
    var = jnp.mean(jnp.square(ag - mu), axis=2, keepdims=True)           # >= 0 by construction
    a_hat = ((ag - mu) * lax.rsqrt(var + GN_EPS)).reshape(B, C)
    a_gn = (a_hat * gn_gamma.reshape(1, C).astype(jnp.float32)
            + gn_beta.reshape(1, C).astype(jnp.float32))
    scale = 1.0 + jax.nn.sigmoid(a_gn)                                   # (B, C) f32

    w2_t = jnp.transpose(w2.reshape(Cout, C)).astype(jnp.float32)        # (C, Cout)
    flops = 2 * B * Np * Cp * Coutp

    # ---- Pallas kernel 2: lane-dense (x*(1+atten)) @ W2, tiled over (batch, spatial) ----
    if fold_weights:
        # Fold the scale into W2 per batch (tiny (B,C,Cout) op); kernel = pure matmul.
        w2s = scale[:, :, None] * w2_t[None, :, :]                       # (B, C, Cout)
        w2s = jnp.pad(w2s, ((0, 0), (0, Cp - C), (0, Coutp - Cout))).astype(mm_dtype)
        bytes_accessed = (x_mm.size + w2s.size + B * Np * Coutp) * mm_itemsize
        out = pl.pallas_call(
            _fold_conv_kernel,
            out_shape=jax.ShapeDtypeStruct((B, Np, Coutp), mm_dtype),
            grid=(B, Np // tile_mm),
            in_specs=[
                pl.BlockSpec((1, tile_mm, Cp), lambda b, n: (b, n, 0)),
                pl.BlockSpec((1, Cp, Coutp), lambda b, n: (b, 0, 0)),
            ],
            out_specs=pl.BlockSpec((1, tile_mm, Coutp), lambda b, n: (b, n, 0)),
            compiler_params=pltpu.CompilerParams(
                dimension_semantics=("parallel", "parallel"),
                vmem_limit_bytes=vmem_limit),
            cost_estimate=pl.CostEstimate(flops=flops, transcendentals=0,
                                          bytes_accessed=bytes_accessed),
        )(x_mm, w2s)
    else:
        # Shared W2 (DMA'd once, constant index_map) + per-batch (1,1,Cp) scale applied on
        # the VPU inside the kernel; no (B,Cp,Coutp) weight materialization in HBM.
        w2p = jnp.pad(w2_t, ((0, Cp - C), (0, Coutp - Cout))).astype(mm_dtype)  # (Cp,Coutp)
        scale_p = jnp.pad(scale, ((0, 0), (0, Cp - C))).astype(mm_dtype)        # (B, Cp)
        scale_p = scale_p.reshape(B, 1, Cp)
        bytes_accessed = (x_mm.size + w2p.size + scale_p.size
                          + B * Np * Coutp) * mm_itemsize
        out = pl.pallas_call(
            _scale_conv_kernel,
            out_shape=jax.ShapeDtypeStruct((B, Np, Coutp), mm_dtype),
            grid=(B, Np // tile_mm),
            in_specs=[
                pl.BlockSpec((1, tile_mm, Cp), lambda b, n: (b, n, 0)),
                pl.BlockSpec((1, 1, Cp), lambda b, n: (b, 0, 0)),
                pl.BlockSpec((Cp, Coutp), lambda b, n: (0, 0)),
            ],
            out_specs=pl.BlockSpec((1, tile_mm, Coutp), lambda b, n: (b, n, 0)),
            compiler_params=pltpu.CompilerParams(
                dimension_semantics=("parallel", "parallel"),
                vmem_limit_bytes=vmem_limit),
            cost_estimate=pl.CostEstimate(flops=flops, transcendentals=0,
                                          bytes_accessed=bytes_accessed),
        )(x_mm, scale_p, w2p)

    # slice + NHWC->NCHW transpose + cast back to the input dtype: one fused XLA pass.
    out = out[:, :N, :Cout].reshape(B, H, W, Cout)
    return jnp.transpose(out, (0, 3, 1, 2)).astype(x_nchw.dtype)         # (B, Cout, H, W)


# --------------------------------------------------------------------------------------
# Pure-JAX reference matching the PyTorch forward (NCHW)
# --------------------------------------------------------------------------------------
def sfe_reference(x, w1, gamma, beta, w2, num_groups=16):
    B, C, H, W = x.shape
    Cout = w2.shape[0]
    gap = jnp.mean(x, axis=(2, 3))                                       # (B, C)
    a = jnp.einsum('bc,oc->bo', gap, w1.reshape(C, C))                   # (B, C)
    ag = a.reshape(B, num_groups, C // num_groups)
    mu = jnp.mean(ag, axis=2, keepdims=True)
    var = jnp.mean((ag - mu) ** 2, axis=2, keepdims=True)
    a_hat = ((ag - mu) / jnp.sqrt(var + GN_EPS)).reshape(B, C)
    a_gn = a_hat * gamma.reshape(1, C) + beta.reshape(1, C)
    atten = jax.nn.sigmoid(a_gn)[:, :, None, None]                       # (B, C, 1, 1)
    xr = x * (1.0 + atten)
    return jnp.einsum('bchw,oc->bohw', xr, w2.reshape(Cout, C))


if __name__ == "__main__":
    B, C_in, C_out, H, W = 2, 64, 64, 8, 8

    key = jax.random.PRNGKey(0)
    k_x, k_w1, k_w2, k_g, k_b = jax.random.split(key, 5)

    x = jax.random.normal(k_x, (B, C_in, H, W), dtype=jnp.float32)
    # conv_atten.weight: (C_in, C_in, 1, 1); conv.weight: (C_out, C_in, 1, 1) — both bias-free
    w1 = jax.random.normal(k_w1, (C_in, C_in, 1, 1), dtype=jnp.float32) * 0.1
    w2 = jax.random.normal(k_w2, (C_out, C_in, 1, 1), dtype=jnp.float32) * 0.1
    # GroupNorm affine params (perturbed from PyTorch defaults to exercise the math)
    gn_gamma = 1.0 + 0.1 * jax.random.normal(k_g, (C_in,), dtype=jnp.float32)
    gn_beta = 0.1 * jax.random.normal(k_b, (C_in,), dtype=jnp.float32)

    ref = sfe_reference(x, w1, gn_gamma, gn_beta, w2)

    # exact path (f32 matmul inputs), auto variant (scale path at this shape) — tight tol
    out_f32 = jax.block_until_ready(
        sfe_forward(x, w1, gn_gamma, gn_beta, w2, use_bf16=False))
    assert out_f32.shape == (B, C_out, H, W)
    err = float(jnp.max(jnp.abs(out_f32 - ref)))
    assert jnp.allclose(out_f32, ref, atol=2e-4, rtol=2e-4), err

    # exact path, forced fold variant — validates the second kernel body too
    out_fold = jax.block_until_ready(
        sfe_forward(x, w1, gn_gamma, gn_beta, w2, use_bf16=False, fold_weights=True))
    err = float(jnp.max(jnp.abs(out_fold - ref)))
    assert jnp.allclose(out_fold, ref, atol=2e-4, rtol=2e-4), err

    # fast path (bf16 MXU inputs/outputs, f32 accumulation) — looser tolerance
    out_bf16 = jax.block_until_ready(
        sfe_forward(x, w1, gn_gamma, gn_beta, w2, use_bf16=True))
    assert out_bf16.shape == (B, C_out, H, W)
    err = float(jnp.max(jnp.abs(out_bf16 - ref)))
    assert jnp.allclose(out_bf16, ref, atol=5e-2, rtol=5e-2), err

    print("KERNEL_OK")
</pallas_src>

<mosaic_0001>
module attributes {stable_mosaic.version = 11 : i64} {
  func.func @_gap_kernel(%arg0: i32, %arg1: i32, %arg2: memref<1x64x128xf32, #tpu.memory_space<vmem>>, %arg3: memref<1x1x128xf32, #tpu.memory_space<vmem>>) attributes {dimension_semantics = [#tpu.dimension_semantics<parallel>, #tpu.dimension_semantics<arbitrary>], iteration_bounds = array<i64: 2, 1>, scalar_prefetch = 0 : i64, scratch_operands = 0 : i64, tpu.core_type = #tpu.core_type<tc>, window_params = [{transform_indices = @transform_0, window_bounds = array<i64: 1, 64, 128>}, {transform_indices = @transform_1, window_bounds = array<i64: 1, 1, 128>}]} {
    %c0_i32 = arith.constant 0 : i32
    %0 = arith.cmpi eq, %arg1, %c0_i32 : i32
    %1 = arith.extui %0 : i1 to i32
    %c0_i32_0 = arith.constant 0 : i32
    %2 = arith.cmpi ne, %1, %c0_i32_0 : i32
    scf.if %2 {
      %cst_9 = arith.constant 0.000000e+00 : f32
      %9 = vector.broadcast %cst_9 : f32 to vector<1x1x128xf32>
      %c0_10 = arith.constant 0 : index
      %c0_11 = arith.constant 0 : index
      %c0_12 = arith.constant 0 : index
      %10 = vector.load %arg3[%c0_10, %c0_11, %c0_12] : memref<1x1x128xf32, #tpu.memory_space<vmem>>, vector<1x1x128xf32>
      tpu.vector_store %arg3[%c0_10, %c0_11, %c0_12], %9 {strides = array<i32>} : memref<1x1x128xf32, #tpu.memory_space<vmem>>, vector<1x1x128xf32>,
    } else {
    }
    %c0 = arith.constant 0 : index
    %c0_1 = arith.constant 0 : index
    %c0_2 = arith.constant 0 : index
    %3 = vector.load %arg3[%c0, %c0_1, %c0_2] : memref<1x1x128xf32, #tpu.memory_space<vmem>>, vector<1x1x128xf32>
    %c0_3 = arith.constant 0 : index
    %c0_4 = arith.constant 0 : index
    %c0_5 = arith.constant 0 : index
    %4 = vector.load %arg2[%c0_3, %c0_4, %c0_5] : memref<1x64x128xf32, #tpu.memory_space<vmem>>, vector<1x64x128xf32>
    %cst = arith.constant dense<0.000000e+00> : vector<1x128xf32>
    %5 = vector.multi_reduction <add>, %4, %cst [1] : vector<1x64x128xf32> to vector<1x128xf32>
    %6 = vector.shape_cast %5 : vector<1x128xf32> to vector<1x1x128xf32>
    %7 = arith.addf %3, %6 : vector<1x1x128xf32>
    %c0_6 = arith.constant 0 : index
    %c0_7 = arith.constant 0 : index
    %c0_8 = arith.constant 0 : index
    %8 = vector.load %arg3[%c0_6, %c0_7, %c0_8] : memref<1x1x128xf32, #tpu.memory_space<vmem>>, vector<1x1x128xf32>
    tpu.vector_store %arg3[%c0_6, %c0_7, %c0_8], %7 {strides = array<i32>} : memref<1x1x128xf32, #tpu.memory_space<vmem>>, vector<1x1x128xf32>,
    return
  }
  func.func @transform_0(%arg0: i32, %arg1: i32) -> (i32, i32, i32) {
    %c0_i32 = arith.constant 0 : i32
    %c0_i32_0 = arith.constant 0 : i32
    return %arg0, %arg1, %c0_i32 : i32, i32, i32
  }
  func.func @transform_1(%arg0: i32, %arg1: i32) -> (i32, i32, i32) {
    %c0_i32 = arith.constant 0 : i32
    %c0_i32_0 = arith.constant 0 : i32
    %c0_i32_1 = arith.constant 0 : i32
    return %arg0, %c0_i32, %c0_i32_0 : i32, i32, i32
  }
}

</mosaic_0001>

<bundles_post_ra>
// kernel: tpu_custom_call.1
= control target key start
LH: loop header
LB: loop body
LE: loop exit
PB: predicated region body
PF: predicated region fallthrough
CT: control target
= control target key end

     0   :  { %6 = vsyncpa [#allocation3], 0  ;;  %s657_s0 = inlined_call_operand.hbm [shape: f32[2,64,128], index: 0, kind: input, shape index: {}]   ;;  %s658_s1 = inlined_call_operand.hbm [shape: f32[2,1,128], index: 1, kind: output, shape index: {}]  }
   0x1   :  { %8 = vsyncpa [#allocation3 + $0x1], 0 }
   0x2   :  { %9 = vsyncpa [#allocation4], 0 }
   0x3   :  { %11 = vsyncpa [#allocation4 + $0x1], 0  ;;  %s477_s6 = smov 0   ;;  %s479_s7 = smov 0  }
   0x4   :  { %s481_s8 = smov 0   ;;  %s483_s9 = smov 0  }
   0x5   :  { %s485_s10 = smov 0   ;;  %s487_s11 = smov 0  }
   0x6 LB: > { %s270_s12 = sadd.s32 4294967295, %s460_s11   ;;  %s271_s13 = sadd.s32 4294967294, %s460_s11   ;;  %s460_s11 = sphi %s487_s11, %s17_s11   ;;  %s456_s10 = sphi %s485_s10, %s673_s10   ;;  %s452_s9 = sphi %s483_s9, %s672_s9   ;;  %s448_s8 = sphi %s481_s8, %s671_s8   ;;  %s444_s7 = sphi %s479_s7, %s670_s7   ;;  %s440_s6 = sphi %s477_s6, %s669_s6  }
   0x7   : > { %s29_s14 = sadd.s32 1, %s456_s10  ;;  %s38_s15 = sadd.s32 1, %s448_s8 }
   0x8   : > { %p31_p0 = scmp.ge.s32.totalorder %s29_s14, 2  ;;  %p45_p1 = scmp.ne.s32.totalorder %s448_s8, %s444_s7 }
   0x9   : > { %p46_p2 = scmp.eq.s32.totalorder %s460_s11, 0  ;;  %p51_p3 = scmp.ne.s32.totalorder %s444_s7, %s440_s6 }
   0xa   : > { %s675_s14 = smov (%p31_p0, %s29_s14), 0  ;;  %p52_p5 = scmp.eq.s32.totalorder %s270_s12, 0 }
   0xb   : > { %p518_p4 = por %p46_p2, %p45_p1  ;;  %s33_s17 = ssub.s32 %s456_s10, %s675_s14 }
   0xc   : > { %p75_p6 = scmp.eq.s32.totalorder %s270_s12, 1  ;;  %p36_p7 = scmp.eq.s32.totalorder %s33_s17, 0 }
   0xd   : > { %p524_p8 = por %p52_p5, %p51_p3  ;;  %p81_p10 = scmp.eq.s32.totalorder %s271_s13, 1 }
   0xe   : > { %p528_p9 = por %p75_p6, %p45_p1  ;;  %p295_p13 = scmp.lt.s32.totalorder %s460_s11, 2 }
   0xf   : > { %s533_s20 = scalar_select %p36_p7, %s448_s8, %s38_s15  }
  0x10   : > { %s662_s19 = scalar_select %p528_p9, 1, 0 }
  0x11   : > { %p535_p11 = por %p81_p10, %p51_p3  ;;  %s101_s22 = sand.u32 1, %s448_s8  }
  0x12   : > { %s274_s23 = sshll.u32 %s101_s22, 6  ;;  %s282_s24 = sshll.u32 %s456_s10, 10 }
  0x13   : > { %s663_s21 = scalar_select %p535_p11, 1, 0 }
  0x14   : > { %s546_s27 = scalar_lea.hbm %s657_s0, %s282_s24  ;;  %s105_s28 = scalar_lea.vmem [#allocation2], %s274_s23 }
  0x15   : > { %s114_s29 = sshll.u32 %s105_s28, 4  ;;  %p552_p0 = pnand %p295_p13, %p518_p4  ;;  %s548_s29 = int_to_ptr.vmem [resolvable:$true] %s114_s29 }
  0x16   : > { %s557_s2 = scalar_lea.sflag [#allocation3], %s101_s22  ;;  %s348_s3 = scalar_lea.hbm %s546_s27, 1024 }
  0x17   : > { %p349_p2 = scmp.ne.s32.totalorder %s546_s27, %s348_s3  ;;  %p350_p3 = pneg %p552_p0 }
  0x18   : > { %s353_s12 = scalar_lea.hbm %s657_s0, 2048  ;;  %p354_p4 = scmp.lt.u32.totalorder %s546_s27, %s657_s0 }
  0x19   : > { %p351_p5 = pnand %p350_p3, %p349_p2  ;;  %p355_p7 = scmp.lt.u32.totalorder %s353_s12, %s348_s3 }
  0x1a   : > { %p357_p13 = scmp.lt.u32.totalorder %s348_s3, %s546_s27 }
  0x1b   : > { %p352_p6 = pneg %p351_p5  ;;  %p356_p10 = por %p355_p7, %p354_p4 }
  0x1d   : > { %p358_p12 = por %p357_p13, %p356_p10 }
  0x1f   : > { %p359_p1 = pnand %p358_p12, %p352_p6 }
  0x21   : > { %362 = shalt.err (!%p359_p1)
}
  0x22   : > { %s363_s16 = scalar_lea.vmem %s548_s29, 1024  ;;  %s462_s17 = smov [#allocation2]  }
  0x23   : > { %p364_p2 = scmp.ne.s32.totalorder %s548_s29, %s363_s16  ;;  %s368_s22 = sshll.u32 %s462_s17, 4  ;;  %s369_s22 = int_to_ptr.vmem [resolvable:$false] %s368_s22 }
  0x24   : > { %s370_s23 = scalar_lea.vmem %s369_s22, 2048  ;;  %p371_p9 = scmp.lt.s32.totalorder %s548_s29, %s369_s22 }
  0x25   : > { %p366_p5 = pnand %p364_p2, %p350_p3  ;;  %p372_p4 = scmp.lt.s32.totalorder %s370_s23, %s363_s16 }
  0x27   : > { %p367_p11 = pneg %p366_p5  ;;  %p373_p7 = por %p372_p4, %p371_p9 }
  0x29   : > { %p374_p10 = pnand %p373_p7, %p367_p11 }
  0x2b   : > { %377 = shalt.err (!%p374_p10)
}
  0x2c   : > { %s463_s24 = smov 128   ;;  %s464_s25 = smov 8  }
  0x2d   : > { %290 = dma.hbm_to_vmem [thread:$0]  (!%p552_p0), %s546_s27, 1024, %s548_s29, %s557_s2, %s463_s24, %s463_s24, %s464_s25  }
  0x2e   : > { %p122_p12 = scmp.lt.s32.totalorder %s460_s11, 3  ;;  %p665_p1 = scmp.ge.s32.totalorder %s460_s11, 1 }
  0x30   : > { %p123_p3 = pnand %p665_p1, %p122_p12 }
  0x31   : > { %s589_s26 = sand.u32 (!%p123_p3), 1, %s444_s7  }
  0x32   : > { %126 = sbr.rel (%p123_p3) target bundleno = 101 (0x65), region = 24  ;;  %s278_s28 = sshll.u32 (!%p123_p3), %s589_s26, 6 }
  0x33   : > { %s129_s3 = scalar_lea.sflag (!%p123_p3), [#allocation3], %s589_s26  ;;  %s132_s4 = scalar_lea.vmem (!%p123_p3), [#allocation2], %s278_s28 }
  0x39   : > { %431 = dma.done.wait (%p524_p8), %s129_s3, 1024  }
  0x3a   : > { %433 = vsyncadd (%p524_p8), %s129_s3, 4294966272  ;;  %s598_s27 = scalar_lea.vmem [#allocation5], %s589_s26  ;;  %v465_v0 = vmov 0.0   ;;  %v157_v1 = vld [vmem:[%s132_s4] sm:$0xff]  ;;  %v158_v2 = vld [vmem:[%s132_s4 + $0x8] sm:$0xff]  ;;  %s279_s18 = sshll.u32 %s452_s9, 4 }
  0x3b   : > { %155 = vst [vmem:[%s598_s27] sm:$0x1] %v465_v0  ;;  %v159_v3 = vld [vmem:[%s132_s4 + $0x10] sm:$0xff]  ;;  %v165_v4 = vadd.f32 %v158_v2, %v157_v1  ;;  %v160_v5 = vld [vmem:[%s132_s4 + $0x18] sm:$0xff]  ;;  %v161_v7 = vld [vmem:[%s132_s4 + $0x20] sm:$0xff]  ;;  %s193_s29 = sshll.u32 %s598_s27, 4  ;;  %s607_s5 = scalar_lea.hbm %s658_s1, %s279_s18  ;;  %s609_s29 = int_to_ptr.vmem [resolvable:$true] %s193_s29 }
  0x3c   : > { %v162_v9 = vld [vmem:[%s132_s4 + $0x28] sm:$0xff]  ;;  %v163_v11 = vld [vmem:[%s132_s4 + $0x30] sm:$0xff]  ;;  %v164_v13 = vld [vmem:[%s132_s4 + $0x38] sm:$0xff]  ;;  %s181_s12 = scalar_lea.sflag [#allocation4], %s589_s26  ;;  %s378_s13 = scalar_lea.vmem %s609_s29, 16 }
  0x3d   : > { %v166_v6 = vadd.f32 %v165_v4, %v159_v3  ;;  %p379_p8 = scmp.ne.s32.totalorder %s609_s29, %s378_s13  ;;  %p666_p9 = scmp.ne.s32.totalorder %s662_s19, 0 }
  0x3e   : > { %s466_s9 = smov [#allocation5]  }
  0x3f   : > { %v167_v8 = vadd.f32 %v166_v6, %v160_v5  ;;  %p380_p11 = pnand %p379_p8, %p666_p9  ;;  %s382_s15 = sshll.u32 %s466_s9, 4  ;;  %s383_s15 = int_to_ptr.vmem [resolvable:$false] %s382_s15 }
  0x40   : > { %s384_s16 = scalar_lea.vmem %s383_s15, 32  ;;  %p385_p6 = scmp.lt.s32.totalorder %s609_s29, %s383_s15 }
  0x41   : > { %v168_v10 = vadd.f32 %v167_v8, %v161_v7  ;;  %p381_p0 = pneg %p380_p11  ;;  %p386_p13 = scmp.lt.s32.totalorder %s384_s16, %s378_s13 }
  0x42   : > { %v156_v21 = vld [vmem:[%s598_s27] sm:$0x1] }
  0x43   : > { %v169_v12 = vadd.f32 %v168_v10, %v162_v9  ;;  %p387_p2 = por %p386_p13, %p385_p6 }
  0x45   : > { %v170_v14 = vadd.f32 %v169_v12, %v163_v11  ;;  %p388_p5 = pnand %p387_p2, %p381_p0 }
  0x47   : > { %v171_v15 = vadd.f32 %v170_v14, %v164_v13 }
  0x49   : > { %v172_v16 = vrot.slane %v171_v15, 4 }
  0x4b   : > { %v173_v17 = vadd.f32 %v172_v16, %v171_v15 }
  0x4d   : > { %v174_v18 = vrot.slane %v173_v17, 2 }
  0x4f   : > { %v175_v19 = vadd.f32 %v174_v18, %v173_v17 }
  0x51   : > { %v176_v20 = vrot.slane %v175_v19, 1 }
  0x53   : > { %v177_v22 = vadd.f32 %v176_v20, %v175_v19 }
  0x55   : > { %v178_v23 = vadd.f32 %v177_v22, %v156_v21 }
  0x57   : > { %179 = vst [vmem:[%s598_s27] sm:$0x1] %v178_v23 }
  0x58   : > { %391 = shalt.err (!%p388_p5)
}
  0x59   : > { %s392_s17 = scalar_lea.hbm %s607_s5, 16  ;;  %s396_s24 = scalar_lea.hbm %s658_s1, 32 }
  0x5a   : > { %p393_p4 = scmp.ne.s32.totalorder %s607_s5, %s392_s17  ;;  %p397_p12 = scmp.lt.u32.totalorder %s607_s5, %s658_s1 }
  0x5b   : > { %p398_p1 = scmp.lt.u32.totalorder %s396_s24, %s392_s17  ;;  %p400_p8 = scmp.lt.u32.totalorder %s392_s17, %s607_s5 }
  0x5c   : > { %p394_p7 = pnand %p393_p4, %p666_p9 }
  0x5d   : > { %p399_p3 = por %p398_p1, %p397_p12 }
  0x5e   : > { %p395_p10 = pneg %p394_p7 }
  0x5f   : > { %p401_p11 = por %p400_p8, %p399_p3 }
  0x61   : > { %p402_p0 = pnand %p401_p11, %p395_p10 }
  0x63   : > { %405 = shalt.err (!%p402_p0)
}
  0x64   : > { %285 = dma.vmem_to_hbm [thread:$0]  (%p666_p9), %s609_s29, 16, %s607_s5, %s181_s12  }
  0x65 PF: > { %s205_s28 = sand.u32 1, %s440_s6   ;;  %p667_p6 = scmp.ne.s32.totalorder %s663_s21, 0 }
  0x66   : > { %p668_p13 = scmp.ge.s32.totalorder %s460_s11, 2  ;;  %s206_s3 = scalar_lea.sflag [#allocation4], %s205_s28 }
  0x68   : > { %p292_p2 = pnand %p668_p13, %p667_p6 }
  0x6a   : > { %435 = dma.done.wait (!%p292_p2), %s206_s3, 16  }
  0x6b   : > { %437 = vsyncadd (!%p292_p2), %s206_s3, 4294967280  ;;  %s17_s11 = sadd.s32 1, %s460_s11   ;;  %s669_s6 = smov %s444_s7 }
  0x6c   : > { %p14_p5 = scmp.ge.s32.totalorder %s17_s11, 4   ;;  %s670_s7 = smov %s448_s8 }
  0x6d   : > { %s671_s8 = smov %s533_s20  ;;  %s672_s9 = smov %s456_s10 }
  0x6e   : > { %s673_s10 = smov %s675_s14  ;;  %16 = sbr.rel (!%p14_p5) target bundleno = 6 (0x6), region = 73 }
  0x75   :  { %210 = vsyncpa [#allocation3], 1 }
  0x76   :  { %212 = vsyncpa [#allocation3 + $0x1], 1 }
  0x77   :  { %213 = vsyncpa [#allocation4], 1 }
  0x78   :  { %215 = vsyncpa [#allocation4 + $0x1], 1 }

</bundles_post_ra>
